<compile_context>
chip_gen: v7x
topology: tpu7x:2x2x1
jax: 0.10.0
libtpu: 0.0.40
codegen_flags: <defaults>
</compile_context>

<pallas_src>
import jax
import jax.numpy as jnp
from jax.experimental import pallas as pl
from jax.experimental.pallas import tpu as pltpu


def _round_up(x, m):
    return ((x + m - 1) // m) * m


# --------------------------------------------------------------------------- #
# Kernel
# --------------------------------------------------------------------------- #
def _fusion_kernel(seq_ref, feat_ref, wa_ref, wb_ref, b1_ref, w2_ref, out_ref):
    L, tb, F1 = seq_ref.shape
    Hpad = wa_ref.shape[1]

    seq3 = seq_ref[...]                                    # (L, tb, F1) native layout
    # bf16 only for the MXU push (zero extra HBM traffic); f32 kept for the epilogue.
    seq_mx = seq3.astype(jnp.bfloat16).reshape(L * tb, F1)  # layout-preserving (tb % 8 == 0)

    # Fused first layer: one wide seq-side matmul + one feature-side matmul (bf16 MXU,
    # f32 accumulation).
    h_seq = jnp.dot(seq_mx, wa_ref[...],
                    preferred_element_type=jnp.float32)     # (L*tb, Hpad)
    h_feat = jnp.dot(feat_ref[...], wb_ref[...],
                     preferred_element_type=jnp.float32)    # (tb, Hpad)

    # Per-batch bias term; broadcast implicitly over L (no materialized temp).
    bias = h_feat + b1_ref[...]                             # (tb, Hpad)
    h = jnp.tanh(h_seq.reshape(L, tb, Hpad) + bias[None, :, :])   # (L, tb, Hpad)

    # Fused second layer: one (Hpad, 3) block-column matmul -> all 3 branch logits.
    # (b2 omitted: constant along the softmax axis, mathematically dead.)
    logits = jnp.dot(h.reshape(L * tb, Hpad), w2_ref[...],
                     preferred_element_type=jnp.float32).reshape(L, tb, 3)

    # Softmax over the sequence (leading) axis -> per-slab VPU max/adds, no XLU.
    m = jnp.max(logits, axis=0, keepdims=True)              # (1, tb, 3)
    e = jnp.exp(logits - m)
    denom = jnp.sum(e, axis=0, keepdims=True)               # (1, tb, 3)
    probs = e * pl.reciprocal(denom, approx=True)           # (L, tb, 3)

    # Combine branches; fold the 1/(3*L) mean factor onto the tiny weights.
    w = jnp.sum(probs, axis=-1, keepdims=True) * (1.0 / (3.0 * L))   # (L, tb, 1)

    out = jnp.sum(seq3.astype(jnp.float32) * w, axis=0)     # (tb, F1), VPU adds over L
    out_ref[...] = out.astype(out_ref.dtype)


# --------------------------------------------------------------------------- #
# Generation-aware VMEM limit & tile picker
# --------------------------------------------------------------------------- #
def _vmem_limit_bytes():
    """Pick a scoped-VMEM limit appropriate for the local TPU generation."""
    try:
        cap = getattr(pltpu.get_tpu_info(), "vmem_capacity_bytes", None)
        if cap is None:
            return 32 * 1024 * 1024
    except Exception:
        return 32 * 1024 * 1024
    if cap <= 64 * 1024 * 1024:          # v7x-class: 64 MiB physical per TC
        return 48 * 1024 * 1024
    return 96 * 1024 * 1024              # v5e / v6e: 128 MiB physical


def _pick_batch_tile(Bpad8, L, F1, Fpad, Hpad, seq_itemsize, vmem_limit_bytes):
    """Largest multiple-of-8 batch tile whose blocks + temporaries fit the budget,
    capped so large batches still get several grid steps (pipelining / megacore)."""
    budget = (vmem_limit_bytes * 3) // 4          # headroom for compiler scratch
    # Resident weight blocks (bf16 wa/wb, f32 b1/w2), x2 pipeline buffers each.
    fixed = 2 * (2 * (F1 * Hpad + Fpad * Hpad) + 4 * (Hpad + 3 * Hpad))
    per_row = (
        2 * seq_itemsize * L * F1      # seq input block, double-buffered
        + 2 * 2 * Fpad                 # bf16 feature block, double-buffered
        + 2 * 4 * F1                   # f32 output block, double-buffered
        + 4 * (2 * L * Hpad            # h_seq + h (f32)
               + 3 * L * 128           # lane-padded logits / e / probs (f32)
               + 2 * L * F1)           # bf16 / f32 seq copies + weighted product
    )
    tb = ((budget - fixed) // per_row) // 8 * 8
    tb = max(8, tb)
    if Bpad8 > 8:
        # keep >= 2 (ideally ~8) grid steps so the "parallel" batch axis actually
        # pipelines and shards across v7x's two TensorCores.
        tb = min(tb, max(8, _round_up(-(-Bpad8 // 8), 8)))
    return min(tb, Bpad8)


# --------------------------------------------------------------------------- #
# Parameters (matches torch.nn.Linear shapes/init style of the module)
# --------------------------------------------------------------------------- #
def init_params(key, f1, f2, f3):
    params = {}
    sizes = {"b1": (f1 + f1, (f1 + f1) // 2),
             "b2": (f1 + f2, (f1 + f2) // 2),
             "b3": (f1 + f3, (f1 + f3) // 2)}
    for name, (d_in, h) in sizes.items():
        key, k1, k2, k3, k4 = jax.random.split(key, 5)
        lim1 = 1.0 / jnp.sqrt(jnp.float32(d_in))
        lim2 = 1.0 / jnp.sqrt(jnp.float32(h))
        params[name] = {
            "w1": jax.random.uniform(k1, (h, d_in), jnp.float32, -lim1, lim1),
            "b1": jax.random.uniform(k2, (h,), jnp.float32, -lim1, lim1),
            "w2": jax.random.uniform(k3, (1, h), jnp.float32, -lim2, lim2),
            "b2": jax.random.uniform(k4, (1,), jnp.float32, -lim2, lim2),
        }
    return params


# --------------------------------------------------------------------------- #
# Wrapper
# --------------------------------------------------------------------------- #
def representation_fusion(params, feature1, feature2, feature3, feature1_seq):
    L, B, F1 = feature1_seq.shape
    F2 = feature2.shape[1]
    F3 = feature3.shape[1]
    H1 = params["b1"]["w1"].shape[0]
    H2 = params["b2"]["w1"].shape[0]
    H3 = params["b3"]["w1"].shape[0]
    Htot = H1 + H2 + H3
    Hpad = _round_up(Htot, 128)
    Ftot = F1 + F2 + F3
    Fpad = _round_up(Ftot, 128)

    f32, bf16 = jnp.float32, jnp.bfloat16

    # --- wrapper-side weight fusion (done once; tiny tensors, so bf16 cast is free) ---
    # seq-side first-layer weights, concatenated along the hidden axis, lane-padded.
    wa = jnp.concatenate([params["b1"]["w1"][:, :F1].T,
                          params["b2"]["w1"][:, :F1].T,
                          params["b3"]["w1"][:, :F1].T], axis=1)          # (F1, Htot)
    wa = jnp.pad(wa, ((0, 0), (0, Hpad - Htot))).astype(bf16)

    # feature-side first-layer weights as a block-diagonal (Fpad, Hpad) matrix.
    wb = jnp.zeros((Fpad, Hpad), f32)
    wb = wb.at[:F1, :H1].set(params["b1"]["w1"][:, F1:].T)
    wb = wb.at[F1:F1 + F2, H1:H1 + H2].set(params["b2"]["w1"][:, F1:].T)
    wb = wb.at[F1 + F2:Ftot, H1 + H2:Htot].set(params["b3"]["w1"][:, F1:].T)
    wb = wb.astype(bf16)

    b1_all = jnp.concatenate([params["b1"]["b1"], params["b2"]["b1"],
                              params["b3"]["b1"]])
    b1_all = jnp.pad(b1_all, (0, Hpad - Htot)).reshape(1, Hpad).astype(f32)

    # second-layer weights as block columns (kept f32: tiny matmul, max precision);
    # b2 dropped (dead under the softmax).
    w2 = jnp.zeros((Hpad, 3), f32)
    w2 = w2.at[:H1, 0].set(params["b1"]["w2"][0])
    w2 = w2.at[H1:H1 + H2, 1].set(params["b2"]["w2"][0])
    w2 = w2.at[H1 + H2:Htot, 2].set(params["b3"]["w2"][0])

    # concatenated (lane-padded, bf16) feature vectors.
    feat_all = jnp.concatenate([feature1, feature2, feature3], axis=1)    # (B, Ftot)
    feat_all = jnp.pad(feat_all, ((0, 0), (0, Fpad - Ftot))).astype(bf16)

    # Native (L, B, F1) sequence layout — NO transpose, NO dtype copy of the big tensor.
    seq = feature1_seq

    # 8-align the batch (only copies when B % 8 != 0, e.g. the tiny demo).
    Bpad8 = _round_up(B, 8)
    if Bpad8 != B:
        seq = jnp.pad(seq, ((0, 0), (0, Bpad8 - B), (0, 0)))
        feat_all = jnp.pad(feat_all, ((0, Bpad8 - B), (0, 0)))

    vmem_limit = _vmem_limit_bytes()
    tb = _pick_batch_tile(Bpad8, L, F1, Fpad, Hpad, seq.dtype.itemsize, vmem_limit)
    nb = (Bpad8 + tb - 1) // tb          # cdiv grid; partial last block is masked

    grid_spec = pltpu.PrefetchScalarGridSpec(
        num_scalar_prefetch=0,
        grid=(nb,),
        in_specs=[
            pl.BlockSpec((L, tb, F1), lambda i: (0, i, 0)),   # seq, batch tiled on middle axis
            pl.BlockSpec((tb, Fpad), lambda i: (i, 0)),       # fused features (bf16)
            pl.BlockSpec((F1, Hpad), lambda i: (0, 0)),       # fused seq-side W1 (bf16)
            pl.BlockSpec((Fpad, Hpad), lambda i: (0, 0)),     # block-diag feat-side W1 (bf16)
            pl.BlockSpec((1, Hpad), lambda i: (0, 0)),        # fused b1 (f32)
            pl.BlockSpec((Hpad, 3), lambda i: (0, 0)),        # packed W2 (f32)
        ],
        out_specs=pl.BlockSpec((tb, F1), lambda i: (i, 0)),
    )

    out = pl.pallas_call(
        _fusion_kernel,
        out_shape=jax.ShapeDtypeStruct((Bpad8, F1), f32),
        grid_spec=grid_spec,
        compiler_params=pltpu.CompilerParams(
            dimension_semantics=("parallel",),
            vmem_limit_bytes=vmem_limit,
        ),
    )(seq, feat_all, wa, wb, b1_all, w2)

    return out[:B] if Bpad8 != B else out


# --------------------------------------------------------------------------- #
# Plain-JAX reference with the exact PyTorch forward semantics
# --------------------------------------------------------------------------- #
def reference(params, feature1, feature2, feature3, feature1_seq):
    L = feature1_seq.shape[0]

    def branch(p, feat):
        x = jnp.concatenate(
            [feature1_seq, jnp.broadcast_to(feat, (L,) + feat.shape)], axis=-1)
        h = jnp.tanh(jnp.einsum("lbi,hi->lbh", x, p["w1"]) + p["b1"])
        return jnp.einsum("lbh,oh->lbo", h, p["w2"]) + p["b2"]           # (L, B, 1)

    l1 = branch(params["b1"], feature1)
    l2 = branch(params["b2"], feature2)
    l3 = branch(params["b3"], feature3)
    w = (jax.nn.softmax(l1, axis=0) + jax.nn.softmax(l2, axis=0)
         + jax.nn.softmax(l3, axis=0))
    return jnp.mean(w * feature1_seq / 3.0, axis=0)


if __name__ == "__main__":
    # Small shapes implied by the forward pass.
    L, B = 8, 2
    ATT1, ATT2, ATT3 = 32, 16, 48

    key = jax.random.PRNGKey(0)
    kp, k1, k2, k3, ks = jax.random.split(key, 5)
    params = init_params(kp, ATT1, ATT2, ATT3)

    feature1 = jax.random.normal(k1, (B, ATT1), jnp.float32)
    feature2 = jax.random.normal(k2, (B, ATT2), jnp.float32)
    feature3 = jax.random.normal(k3, (B, ATT3), jnp.float32)
    feature1_seq = jax.random.normal(ks, (L, B, ATT1), jnp.float32)

    out = representation_fusion(params, feature1, feature2, feature3, feature1_seq)
    out = jax.block_until_ready(out)

    ref = reference(params, feature1, feature2, feature3, feature1_seq)
    assert out.shape == (B, ATT1), out.shape
    assert jnp.allclose(out, ref, rtol=2e-3, atol=2e-3), (
        f"max abs err {jnp.max(jnp.abs(out - ref))}")

    print("KERNEL_OK")
</pallas_src>

<mosaic_0001>
module attributes {stable_mosaic.version = 11 : i64} {
  func.func @_fusion_kernel(%arg0: i32, %arg1: memref<8x8x32xf32, #tpu.memory_space<vmem>>, %arg2: memref<8x128xbf16, #tpu.memory_space<vmem>>, %arg3: memref<32x128xbf16, #tpu.memory_space<vmem>>, %arg4: memref<128x128xbf16, #tpu.memory_space<vmem>>, %arg5: memref<1x128xf32, #tpu.memory_space<vmem>>, %arg6: memref<128x3xf32, #tpu.memory_space<vmem>>, %arg7: memref<8x32xf32, #tpu.memory_space<vmem>>) attributes {dimension_semantics = [#tpu.dimension_semantics<parallel>], iteration_bounds = array<i64: 1>, scalar_prefetch = 0 : i64, scratch_operands = 0 : i64, tpu.core_type = #tpu.core_type<tc>, window_params = [{transform_indices = @transform_0, window_bounds = array<i64: 8, 8, 32>}, {transform_indices = @transform_1, window_bounds = array<i64: 8, 128>}, {pipeline_mode = #tpu.pipeline_mode<synchronous>, transform_indices = @transform_2, window_bounds = array<i64: 32, 128>}, {pipeline_mode = #tpu.pipeline_mode<synchronous>, transform_indices = @transform_3, window_bounds = array<i64: 128, 128>}, {pipeline_mode = #tpu.pipeline_mode<synchronous>, transform_indices = @transform_4, window_bounds = array<i64: 1, 128>}, {pipeline_mode = #tpu.pipeline_mode<synchronous>, transform_indices = @transform_5, window_bounds = array<i64: 128, 3>}, {transform_indices = @transform_6, window_bounds = array<i64: 8, 32>}]} {
    %c0 = arith.constant 0 : index
    %c0_0 = arith.constant 0 : index
    %c0_1 = arith.constant 0 : index
    %0 = vector.load %arg1[%c0, %c0_0, %c0_1] : memref<8x8x32xf32, #tpu.memory_space<vmem>>, vector<8x8x32xf32>
    %1 = arith.truncf %0 : vector<8x8x32xf32> to vector<8x8x32xbf16>
    %2 = vector.shape_cast %1 : vector<8x8x32xbf16> to vector<64x32xbf16>
    %c0_2 = arith.constant 0 : index
    %c0_3 = arith.constant 0 : index
    %3 = vector.load %arg3[%c0_2, %c0_3] : memref<32x128xbf16, #tpu.memory_space<vmem>>, vector<32x128xbf16>
    %cst = arith.constant dense<0.000000e+00> : vector<64x128xf32>
    %4 = tpu.matmul %2, %3, %cst {dimension_numbers = #tpu.dot_dimension_numbers<[1], [0], [0], [1], [0, 0, 1, 1], [], []>} : vector<64x32xbf16>, vector<32x128xbf16>, vector<64x128xf32> -> vector<64x128xf32>
    %c0_4 = arith.constant 0 : index
    %c0_5 = arith.constant 0 : index
    %5 = vector.load %arg2[%c0_4, %c0_5] : memref<8x128xbf16, #tpu.memory_space<vmem>>, vector<8x128xbf16>
    %c0_6 = arith.constant 0 : index
    %c0_7 = arith.constant 0 : index
    %6 = vector.load %arg4[%c0_6, %c0_7] : memref<128x128xbf16, #tpu.memory_space<vmem>>, vector<128x128xbf16>
    %cst_8 = arith.constant dense<0.000000e+00> : vector<8x128xf32>
    %7 = tpu.matmul %5, %6, %cst_8 {dimension_numbers = #tpu.dot_dimension_numbers<[1], [0], [0], [1], [0, 0, 1, 1], [], []>} : vector<8x128xbf16>, vector<128x128xbf16>, vector<8x128xf32> -> vector<8x128xf32>
    %c0_9 = arith.constant 0 : index
    %c0_10 = arith.constant 0 : index
    %8 = vector.load %arg5[%c0_9, %c0_10] : memref<1x128xf32, #tpu.memory_space<vmem>>, vector<1x128xf32>
    %9 = vector.broadcast %8 : vector<1x128xf32> to vector<8x128xf32>
    %10 = arith.addf %7, %9 : vector<8x128xf32>
    %11 = vector.shape_cast %4 : vector<64x128xf32> to vector<8x8x128xf32>
    %12 = vector.shape_cast %10 : vector<8x128xf32> to vector<1x8x128xf32>
    %13 = vector.broadcast %12 : vector<1x8x128xf32> to vector<8x8x128xf32>
    %14 = arith.addf %11, %13 : vector<8x8x128xf32>
    %15 = math.tanh %14 : vector<8x8x128xf32>
    %16 = vector.shape_cast %15 : vector<8x8x128xf32> to vector<64x128xf32>
    %c0_11 = arith.constant 0 : index
    %c0_12 = arith.constant 0 : index
    %17 = vector.load %arg6[%c0_11, %c0_12] : memref<128x3xf32, #tpu.memory_space<vmem>>, vector<128x3xf32>
    %cst_13 = arith.constant dense<0.000000e+00> : vector<64x3xf32>
    %18 = tpu.matmul %16, %17, %cst_13 {dimension_numbers = #tpu.dot_dimension_numbers<[1], [0], [0], [1], [0, 0, 1, 1], [], []>} : vector<64x128xf32>, vector<128x3xf32>, vector<64x3xf32> -> vector<64x3xf32>
    %19 = vector.shape_cast %18 : vector<64x3xf32> to vector<8x8x3xf32>
    %cst_14 = arith.constant dense<0xFF800000> : vector<8x3xf32>
    %20 = vector.multi_reduction <maximumf>, %19, %cst_14 [0] : vector<8x8x3xf32> to vector<8x3xf32>
    %21 = vector.shape_cast %20 : vector<8x3xf32> to vector<1x8x3xf32>
    %22 = vector.broadcast %21 : vector<1x8x3xf32> to vector<8x8x3xf32>
    %23 = arith.subf %19, %22 : vector<8x8x3xf32>
    %24 = math.exp %23 : vector<8x8x3xf32>
    %cst_15 = arith.constant dense<0.000000e+00> : vector<8x3xf32>
    %25 = vector.multi_reduction <add>, %24, %cst_15 [0] : vector<8x8x3xf32> to vector<8x3xf32>
    %26 = vector.shape_cast %25 : vector<8x3xf32> to vector<1x8x3xf32>
    %27 = tpu.reciprocal %26 {approx = true} : vector<1x8x3xf32> -> vector<1x8x3xf32>
    %28 = vector.broadcast %27 : vector<1x8x3xf32> to vector<8x8x3xf32>
    %29 = arith.mulf %24, %28 : vector<8x8x3xf32>
    %cst_16 = arith.constant dense<0.000000e+00> : vector<8x8xf32>
    %30 = vector.multi_reduction <add>, %29, %cst_16 [2] : vector<8x8x3xf32> to vector<8x8xf32>
    %31 = vector.shape_cast %30 : vector<8x8xf32> to vector<8x8x1xf32>
    %cst_17 = arith.constant 0.0416666679 : f32
    %32 = vector.broadcast %cst_17 : f32 to vector<8x8x1xf32>
    %33 = arith.mulf %31, %32 : vector<8x8x1xf32>
    %34 = vector.broadcast %33 : vector<8x8x1xf32> to vector<8x8x32xf32>
    %35 = arith.mulf %0, %34 : vector<8x8x32xf32>
    %cst_18 = arith.constant dense<0.000000e+00> : vector<8x32xf32>
    %36 = vector.multi_reduction <add>, %35, %cst_18 [0] : vector<8x8x32xf32> to vector<8x32xf32>
    %c0_19 = arith.constant 0 : index
    %c0_20 = arith.constant 0 : index
    %37 = vector.load %arg7[%c0_19, %c0_20] : memref<8x32xf32, #tpu.memory_space<vmem>>, vector<8x32xf32>
    tpu.vector_store %arg7[%c0_19, %c0_20], %36 {strides = array<i32>} : memref<8x32xf32, #tpu.memory_space<vmem>>, vector<8x32xf32>,
    return
  }
  func.func @transform_0(%arg0: i32) -> (i32, i32, i32) {
    %c0_i32 = arith.constant 0 : i32
    %c0_i32_0 = arith.constant 0 : i32
    %c0_i32_1 = arith.constant 0 : i32
    return %c0_i32, %arg0, %c0_i32_0 : i32, i32, i32
  }
  func.func @transform_1(%arg0: i32) -> (i32, i32) {
    %c0_i32 = arith.constant 0 : i32
    %c0_i32_0 = arith.constant 0 : i32
    return %arg0, %c0_i32 : i32, i32
  }
  func.func @transform_2(%arg0: i32) -> (i32, i32) {
    %c0_i32 = arith.constant 0 : i32
    %c0_i32_0 = arith.constant 0 : i32
    %c0_i32_1 = arith.constant 0 : i32
    return %c0_i32, %c0_i32_0 : i32, i32
  }
  func.func @transform_3(%arg0: i32) -> (i32, i32) {
    %c0_i32 = arith.constant 0 : i32
    %c0_i32_0 = arith.constant 0 : i32
    %c0_i32_1 = arith.constant 0 : i32
    return %c0_i32, %c0_i32_0 : i32, i32
  }
  func.func @transform_4(%arg0: i32) -> (i32, i32) {
    %c0_i32 = arith.constant 0 : i32
    %c0_i32_0 = arith.constant 0 : i32
    %c0_i32_1 = arith.constant 0 : i32
    return %c0_i32, %c0_i32_0 : i32, i32
  }
  func.func @transform_5(%arg0: i32) -> (i32, i32) {
    %c0_i32 = arith.constant 0 : i32
    %c0_i32_0 = arith.constant 0 : i32
    %c0_i32_1 = arith.constant 0 : i32
    return %c0_i32, %c0_i32_0 : i32, i32
  }
  func.func @transform_6(%arg0: i32) -> (i32, i32) {
    %c0_i32 = arith.constant 0 : i32
    %c0_i32_0 = arith.constant 0 : i32
    return %arg0, %c0_i32 : i32, i32
  }
}

</mosaic_0001>

<bundles_post_ra>
// kernel: tpu_custom_call.1
= control target key start
LH: loop header
LB: loop body
LE: loop exit
PB: predicated region body
PF: predicated region fallthrough
CT: control target
= control target key end

     0   :  { %11 = vsyncpa [#allocation3], 0  ;;  %s1057_s0 = inlined_call_operand.vmem [shape: f32[8,8,32], index: 0, kind: input, shape index: {}]   ;;  %s1058_s1 = inlined_call_operand.vmem [shape: bf16[8,128], index: 1, kind: input, shape index: {}]   ;;  %s1059_s2 = inlined_call_operand.hbm [shape: bf16[32,128], index: 2, kind: input, shape index: {}]   ;;  %s1060_s3 = inlined_call_operand.vmem [shape: bf16[128,128], index: 3, kind: input, shape index: {}]   ;;  %s1061_s4 = inlined_call_operand.vmem [shape: f32[1,128], index: 4, kind: input, shape index: {}]   ;;  %s1062_s5 = inlined_call_operand.vmem [shape: f32[128,3], index: 5, kind: input, shape index: {}]   ;;  %s1063_s6 = inlined_call_operand.hbm [shape: f32[8,32], index: 6, kind: output, shape index: {}]  }
   0x1   :  { %12 = vsyncpa [#allocation4], 0  ;;  %s821_s21 = smov [#allocation2]   ;;  %s773_s25 = scalar_lea.hbm %s1059_s2, 256 }
   0x2   :  { %s22_s22 = sshll.u32 %s821_s21, 4  ;;  %p774_p0 = scmp.ne.s32.totalorder %s1059_s2, %s773_s25  ;;  %s23_s22 = int_to_ptr.vmem [resolvable:$true] %s22_s22 }
   0x3   :  { %p777_p1 = scmp.lt.u32.totalorder %s773_s25, %s1059_s2 }
   0x5   :  { %p779_p2 = pnand %p777_p1, %p774_p0 }
   0x7   :  { %782 = shalt.err (!%p779_p2)
}
   0x8   :  { %s783_s30 = scalar_lea.vmem %s23_s22, 256  ;;  %p788_p4 = scmp.lt.s32.totalorder %s23_s22, %s23_s22 }
   0x9   :  { %p784_p3 = scmp.ne.s32.totalorder %s23_s22, %s783_s30  ;;  %p789_p5 = scmp.lt.s32.totalorder %s783_s30, %s783_s30 }
   0xb   :  { %p790_p6 = por %p789_p5, %p788_p4 }
   0xd   :  { %p791_p7 = pnand %p790_p6, %p784_p3 }
   0xf   :  { %794 = shalt.err (!%p791_p7)
}
  0x10   :  { %s822_s7 = smov 64   ;;  %s823_s8 = smov 4  }
  0x11   :  { %28 = dma.hbm_to_vmem [thread:$0]  %s1059_s2, 256, %s23_s22, [#allocation3], %s822_s7, %s822_s7, %s823_s8  }
  0x12   :  { %817 = dma.done.wait [#allocation3], 256  }
  0x13   :  { %818 = vsyncadd [#allocation3], 4294967040  ;;  %v729_v0 = vld [vmem:[#allocation2] sm:$0xff]   ;;  %v730_v1 = vld [vmem:[#allocation2 + $0x8] sm:$0xff]   ;;  %vm91_vm0 = vcmask 261120   ;;  %v824_v9 = vmov 0.0  }
  0x14   :  { %615 = vmatprep.subr.bf16.mxu1 %v729_v0  ;;  %v877_v2 = vld [vmem:[%s1057_s0] sm:$0xff]  ;;  %v882_v3 = vld [vmem:[%s1057_s0 + $0x8] sm:$0xff]  ;;  %v887_v4 = vld [vmem:[%s1057_s0 + $0x10] sm:$0xff]  ;;  %vm825_vm1 = vmmov 0   ;;  %vm418_vm2 = vcmask 23552  }
  0x15   :  { %616 = vmatpush3.bf16.msra.mxu1 %v729_v0  ;;  %v572_v5 = vpack.c.bf16 %v882_v3, %v877_v2  ;;  %v894_v6 = vld [vmem:[%s1057_s0 + $0x18] sm:$0xff]  ;;  %v731_v8 = vld [vmem:[%s1060_s3] sm:$0xff]   ;;  %v910_v11 = vld [vmem:[%s1057_s0 + $0x28] sm:$0xff] }
  0x16   :  { %617 = vmatprep.subr.bf16.mxu1 %v730_v1  ;;  %v573_v7 = vpack.c.bf16 %v894_v6, %v887_v4  ;;  %v905_v10 = vld [vmem:[%s1057_s0 + $0x20] sm:$0xff]  ;;  %v732_v12 = vld [vmem:[%s1060_s3 + $0x8] sm:$0xff]   ;;  %v921_v14 = vld [vmem:[%s1057_s0 + $0x30] sm:$0xff] }
  0x17   :  { %619 = vmatprep.mubr.msk.bf16.mxu1 %vm91_vm0, %v572_v5  ;;  %v574_v13 = vpack.c.bf16 %v910_v11, %v905_v10  ;;  %v927_v15 = vld [vmem:[%s1057_s0 + $0x38] sm:$0xff]  ;;  %v733_v17 = vld [vmem:[%s1060_s3 + $0x10] sm:$0xff]   ;;  %v735_v19 = vld [vmem:[%s1060_s3 + $0x20] sm:$0xff]  }
  0x18   :  { %v575_v16 = vpack.c.bf16 %v927_v15, %v921_v14  ;;  %v734_v18 = vld [vmem:[%s1060_s3 + $0x18] sm:$0xff]   ;;  %v736_v20 = vld [vmem:[%s1060_s3 + $0x28] sm:$0xff]   ;;  %v737_v21 = vld [vmem:[%s1060_s3 + $0x30] sm:$0xff]  }
  0x19   :  { %618 = vmatpush3.bf16.msra.mxu1 %v730_v1  ;;  %v738_v22 = vld [vmem:[%s1060_s3 + $0x38] sm:$0xff]   ;;  %v169_v23 = vld [vmem:[%s1058_s1] sm:$0xf]  ;;  %v298_v25 = vld [vmem:[%s1062_s5 + $0x8] sm:$0xff] }
  0x1a   :  { %627 = vmatprep.subr.bf16.mxu1 %v824_v9  ;;  %v297_v24 = vld [vmem:[%s1062_s5] sm:$0xff]  ;;  %v299_v27 = vld [vmem:[%s1062_s5 + $0x10] sm:$0xff]  ;;  %v300_v28 = vld [vmem:[%s1062_s5 + $0x18] sm:$0xff] }
  0x1b   :  { %v691_v26 = vpack.c.bf16 %v298_v25, %v297_v24  ;;  %v695_v29 = vpack.c.bf16 %v300_v28, %v299_v27  ;;  %v301_v30 = vld [vmem:[%s1062_s5 + $0x20] sm:$0xff]  ;;  %v302_v31 = vld [vmem:[%s1062_s5 + $0x28] sm:$0xff]  ;;  %v303_v32 = vld [vmem:[%s1062_s5 + $0x30] sm:$0xff] }
  0x1c   :  { %620 = vmatmul.mubr.msk.bf16.vlgmr.msra.gmra.mrb[0].mxu1 %vm91_vm0, %v573_v7  ;;  %v699_v33 = vpack.c.bf16 %v302_v31, %v301_v30  ;;  %v304_v34 = vld [vmem:[%s1062_s5 + $0x38] sm:$0xff]  ;;  %v305_v36 = vld [vmem:[%s1062_s5 + $0x40] sm:$0xff]  ;;  %v306_v37 = vld [vmem:[%s1062_s5 + $0x48] sm:$0xff] }
  0x1d   :  { %628 = vmatpush3.bf16.msra.mxu1 %v731_v8  ;;  %623 = vmatprep.mubr.msk.bf16.mxu1 %vm91_vm0, %v574_v13  ;;  %v703_v35 = vpack.c.bf16 %v304_v34, %v303_v32  ;;  %v707_v38 = vpack.c.bf16 %v306_v37, %v305_v36  ;;  %v307_v39 = vld [vmem:[%s1062_s5 + $0x50] sm:$0xff]  ;;  %v308_v40 = vld [vmem:[%s1062_s5 + $0x58] sm:$0xff]  ;;  %v309_v42 = vld [vmem:[%s1062_s5 + $0x60] sm:$0xff] }
  0x1e   :  { %629 = vmatprep.subr.bf16.mxu1 %v824_v9  ;;  %692 = vmatprep.subr.bf16.mxu0 %v691_v26  ;;  %v711_v41 = vpack.c.bf16 %v308_v40, %v307_v39  ;;  %v310_v43 = vld [vmem:[%s1062_s5 + $0x68] sm:$0xff]  ;;  %v311_v45 = vld [vmem:[%s1062_s5 + $0x70] sm:$0xff]  ;;  %v312_v46 = vld [vmem:[%s1062_s5 + $0x78] sm:$0xff] }
  0x1f   :  { %694 = vmatpush3.bf16.msra.mxu0 %v691_v26  ;;  %v715_v44 = vpack.c.bf16 %v310_v43, %v309_v42  ;;  %v719_v47 = vpack.c.bf16 %v312_v46, %v311_v45  ;;  %v563_v56 = vld [vmem:[%s1061_s4] ss:$0 sm:$0xff]  ;;  %s826_s4 = smov [#allocation5]  }
  0x20   :  { %696 = vmatprep.subr.bf16.mxu0 %v695_v29  ;;  %s544_s5 = sshll.u32 %s826_s4, 4  ;;  %s545_s5 = int_to_ptr.vmem [resolvable:$true] %s544_s5 }
  0x21   :  { %630 = vmatpush3.bf16.msra.mxu1 %v732_v12  ;;  %s795_s23 = scalar_lea.vmem %s545_s5, 128  ;;  %p800_p9 = scmp.lt.s32.totalorder %s545_s5, %s545_s5 }
  0x22   :  { %631 = vmatprep.subr.bf16.mxu1 %v824_v9  ;;  %p796_p8 = scmp.ne.s32.totalorder %s545_s5, %s795_s23  ;;  %p801_p10 = scmp.lt.s32.totalorder %s795_s23, %s795_s23 }
  0x23   :  { %698 = vmatpush3.bf16.msra.mxu0 %v695_v29 }
  0x24   :  { %624 = vmatmul.mubr.msk.bf16.gmra.mrb[4].mxu1 %vm91_vm0, %v575_v16  ;;  %700 = vmatprep.subr.bf16.mxu0 %v699_v33  ;;  %p802_p11 = por %p801_p10, %p800_p9 }
  0x25   :  { %632 = vmatpush3.bf16.msra.mxu1 %v733_v17  ;;  %643 = vmatprep.mubr.msk.bf16.mxu1 %vm825_vm1, %v824_v9 }
  0x26   :  { %633 = vmatprep.subr.bf16.mxu1 %v824_v9  ;;  %p803_p12 = pnand %p802_p11, %p796_p8 }
  0x27   :  { %702 = vmatpush3.bf16.msra.mxu0 %v699_v33 }
  0x28   :  { %704 = vmatprep.subr.bf16.mxu0 %v703_v35 }
  0x29   :  { %634 = vmatpush3.bf16.msra.mxu1 %v734_v18 }
  0x2a   :  { %635 = vmatprep.subr.bf16.mxu1 %v824_v9 }
  0x2b   :  { %706 = vmatpush3.bf16.msra.mxu0 %v703_v35 }
  0x2c   :  { %708 = vmatprep.subr.bf16.mxu0 %v707_v38 }
  0x2d   :  { %636 = vmatpush3.bf16.msra.mxu1 %v735_v19 }
  0x2e   :  { %637 = vmatprep.subr.bf16.mxu1 %v824_v9 }
  0x2f   :  { %710 = vmatpush3.bf16.msra.mxu0 %v707_v38 }
  0x30   :  { %712 = vmatprep.subr.bf16.mxu0 %v711_v41 }
  0x31   :  { %638 = vmatpush3.bf16.msra.mxu1 %v736_v20 }
  0x32   :  { %639 = vmatprep.subr.bf16.mxu1 %v824_v9 }
  0x33   :  { %714 = vmatpush3.bf16.msra.mxu0 %v711_v41 }
  0x34   :  { %716 = vmatprep.subr.bf16.mxu0 %v715_v44 }
  0x35   :  { %640 = vmatpush3.bf16.msra.mxu1 %v737_v21 }
  0x36   :  { %641 = vmatprep.subr.bf16.mxu1 %v824_v9 }
  0x37   :  { %718 = vmatpush3.bf16.msra.mxu0 %v715_v44 }
  0x38   :  { %720 = vmatprep.subr.bf16.mxu0 %v719_v47 }
  0x39   :  { %642 = vmatpush3.bf16.msra.mxu1 %v738_v22 }
  0x3b   :  { %722 = vmatpush3.bf16.msra.mxu0 %v719_v47 }
  0x3c   :  { %644 = vmatmul.mubr.bf16.vlgmr.msra.gmra.mrb[8].mxu1 %v169_v23 }
  0xef   :  { %v621_v48 = vpop.f32.mrb[0].mxu1 }
  0xf0   :  { %v138_v49 = vpop.f32.mrb[1].mxu1 }
  0xf1   :  { %v622_v50 = vpop.f32.mrb[2].mxu1 }
  0xf2   :  { %v141_v51 = vpop.f32.mrb[3].mxu1 }
  0xf7   :  { %v625_v52 = vpop.f32.mrb[4].mxu1 }
  0xf8   :  { %v154_v53 = vpop.f32.mrb[5].mxu1 }
  0xf9   :  { %v626_v54 = vpop.f32.mrb[6].mxu1 }
  0xfa   :  { %v157_v55 = vpop.f32.mrb[7].mxu1 }
 0x10f   :  { %v275_v57 = vpop.f32.mrb[8].mxu1 }
 0x110   :  { %v276_v58 = vadd.f32 %v563_v56, %v275_v57  ;;  %v645_v59 = vpop.f32.mrb[9].mxu1 }
 0x111   :  { %v278_v60 = vpop.f32.mrb[10].mxu1 }
 0x112   :  { %v646_v61 = vpop.f32.mrb[11].mxu1  ;;  %v281_v62 = vadd.f32 %v276_v58, %v138_v49  ;;  %v282_v63 = vadd.f32 %v276_v58, %v141_v51  ;;  %v283_v0 = vadd.f32 %v621_v48, %v276_v58  ;;  %v284_v1 = vadd.f32 %v622_v50, %v276_v58 }
 0x113   :  { %v285_v5 = vadd.f32 %v276_v58, %v154_v53  ;;  %v286_v7 = vadd.f32 %v276_v58, %v157_v55  ;;  %v287_v8 = vadd.f32 %v625_v52, %v276_v58  ;;  %v288_v9 = vadd.f32 %v626_v54, %v276_v58 }
 0x114   :  { %739 = vtanh.f32 %v281_v62 }
 0x115   :  { %741 = vtanh.f32 %v282_v63 }
 0x116   :  { %743 = vtanh.f32 %v283_v0 }
 0x117   :  { %745 = vtanh.f32 %v284_v1 }
 0x118   :  { %747 = vtanh.f32 %v285_v5 }
 0x119   :  { %749 = vtanh.f32 %v286_v7 }
 0x11a   :  { %751 = vtanh.f32 %v287_v8 }
 0x11b   :  { %753 = vtanh.f32 %v288_v9 }
 0x11e   :  { %v740_v12 = vpop.eup %739 }
 0x11f   :  { %v742_v13 = vpop.eup %741  ;;  %679 = vmatprep.mubr.f32.mxu0 %v740_v12 }
 0x120   :  { %v744_v16 = vpop.eup %743  ;;  %680 = vmatmul.mubr.f32.vlgmr.msra.gmra.mrb[0].mxu0 %v742_v13 }
 0x121   :  { %682 = vmatprep.mubr.f32.mxu0 %v744_v16  ;;  %v746_v17 = vpop.eup %745 }
 0x122   :  { %v748_v18 = vpop.eup %747 }
 0x123   :  { %v750_v19 = vpop.eup %749 }
 0x124   :  { %683 = vmatmul.mubr.f32.gmra.mrb[2].mxu0 %v746_v17  ;;  %v752_v20 = vpop.eup %751 }
 0x125   :  { %685 = vmatprep.mubr.f32.mxu0 %v748_v18  ;;  %v754_v21 = vpop.eup %753 }
 0x128   :  { %686 = vmatmul.mubr.f32.gmra.mrb[4].mxu0 %v750_v19 }
 0x129   :  { %688 = vmatprep.mubr.f32.mxu0 %v752_v20 }
 0x12c   :  { %689 = vmatmul.mubr.f32.gmra.mrb[6].mxu0 %v754_v21 }
 0x1f3   :  { %v681_v22 = vpop.f32.mrb[0].mxu0 }
 0x1f4   :  { %v379_v23 = vpop.f32.mrb[1].mxu0  ;;  %v420_v27 = vsel %vm418_vm2, %v681_v22, -inf }
 0x1f5   :  { %v419_v30 = vsel %vm418_vm2, %v379_v23, -inf }
 0x1f7   :  { %v684_v24 = vpop.f32.mrb[2].mxu0 }
 0x1f8   :  { %v389_v25 = vpop.f32.mrb[3].mxu0  ;;  %v422_v35 = vsel %vm418_vm2, %v684_v24, -inf }
 0x1f9   :  { %v421_v39 = vsel %vm418_vm2, %v389_v25, -inf }
 0x1fb   :  { %v687_v26 = vpop.f32.mrb[4].mxu0 }
 0x1fc   :  { %v425_v28 = vsel %vm418_vm2, %v687_v26, -inf  ;;  %v399_v29 = vpop.f32.mrb[5].mxu0 }
 0x1fd   :  { %v426_v31 = vmax.f32 %v420_v27, %v425_v28  ;;  %v423_v32 = vsel %vm418_vm2, %v399_v29, -inf }
 0x1fe   :  { %v424_v33 = vmax.f32 %v419_v30, %v423_v32 }
 0x1ff   :  { %v690_v34 = vpop.f32.mrb[6].mxu0 }
 0x200   :  { %v431_v36 = vmax.f32 %v424_v33, %v426_v31  ;;  %v429_v37 = vsel %vm418_vm2, %v690_v34, -inf  ;;  %v409_v38 = vpop.f32.mrb[7].mxu0 }
 0x201   :  { %v430_v40 = vmax.f32 %v422_v35, %v429_v37  ;;  %v427_v41 = vsel %vm418_vm2, %v409_v38, -inf }
 0x202   :  { %v428_v42 = vmax.f32 %v421_v39, %v427_v41 }
 0x204   :  { %v432_v43 = vmax.f32 %v428_v42, %v430_v40 }
 0x206   :  { %v433_v44 = vmax.f32 %v431_v36, %v432_v43 }
 0x208   :  { %v434_v45 = vsub.f32 %v379_v23, %v433_v44  ;;  %v435_v46 = vsub.f32 %v681_v22, %v433_v44  ;;  %v437_v47 = vsub.f32 %v684_v24, %v433_v44  ;;  %v438_v48 = vsub.f32 %v399_v29, %v433_v44 }
 0x209   :  { %v439_v49 = vsub.f32 %v687_v26, %v433_v44  ;;  %v440_v50 = vsub.f32 %v409_v38, %v433_v44  ;;  %v441_v51 = vsub.f32 %v690_v34, %v433_v44  ;;  %v436_v52 = vsub.f32 %v389_v25, %v433_v44 }
 0x20a   :  { %v442_v53 = vmul.f32 1.442695, %v434_v45  ;;  %v444_v54 = vmul.f32 1.442695, %v435_v46  ;;  %v448_v55 = vmul.f32 1.442695, %v437_v47 }
 0x20b   :  { %v446_v56 = vmul.f32 1.442695, %v436_v52  ;;  %v450_v57 = vmul.f32 1.442695, %v438_v48  ;;  %v452_v58 = vmul.f32 1.442695, %v439_v49 }
 0x20c   :  { %755 = vpow2.f32 %v442_v53  ;;  %v454_v59 = vmul.f32 1.442695, %v440_v50  ;;  %v456_v62 = vmul.f32 1.442695, %v441_v51 }
 0x20d   :  { %757 = vpow2.f32 %v444_v54 }
 0x20e   :  { %759 = vpow2.f32 %v448_v55 }
 0x20f   :  { %761 = vpow2.f32 %v446_v56 }
 0x210   :  { %763 = vpow2.f32 %v450_v57 }
 0x211   :  { %765 = vpow2.f32 %v452_v58 }
 0x212   :  { %767 = vpow2.f32 %v454_v59 }
 0x213   :  { %769 = vpow2.f32 %v456_v62 }
 0x216   :  { %v756_v60 = vpop.eup %755 }
 0x217   :  { %v758_v61 = vpop.eup %757  ;;  %v458_v63 = vsel %vm418_vm2, %v756_v60, 0.0 }
 0x218   :  { %v459_v0 = vsel %vm418_vm2, %v758_v61, 0.0  ;;  %v760_v5 = vpop.eup %759 }
 0x219   :  { %v460_v1 = vadd.f32 %v459_v0, %v458_v63  ;;  %v762_v7 = vpop.eup %761  ;;  %v463_v13 = vsel %vm418_vm2, %v760_v5, 0.0 }
 0x21a   :  { %v461_v8 = vsel %vm418_vm2, %v762_v7, 0.0  ;;  %v764_v9 = vpop.eup %763 }
 0x21b   :  { %v462_v12 = vadd.f32 %v461_v8, %v460_v1  ;;  %v766_v16 = vpop.eup %765  ;;  %v465_v18 = vsel %vm418_vm2, %v764_v9, 0.0 }
 0x21c   :  { %v768_v19 = vpop.eup %767  ;;  %v467_v21 = vsel %vm418_vm2, %v766_v16, 0.0 }
 0x21d   :  { %v464_v17 = vadd.f32 %v463_v13, %v462_v12  ;;  %v770_v22 = vpop.eup %769  ;;  %v469_v24 = vsel %vm418_vm2, %v768_v19, 0.0 }
 0x21e   :  { %v471_v26 = vsel %vm418_vm2, %v770_v22, 0.0 }
 0x21f   :  { %v466_v20 = vadd.f32 %v465_v18, %v464_v17 }
 0x221   :  { %v468_v23 = vadd.f32 %v467_v21, %v466_v20 }
 0x223   :  { %v470_v25 = vadd.f32 %v469_v24, %v468_v23 }
 0x225   :  { %v472_v27 = vadd.f32 %v471_v26, %v470_v25 }
 0x227   :  { %771 = vrcp.f32 %v472_v27 }
 0x231   :  { %v772_v28 = vpop.eup %771 }
 0x232   :  { %v476_v29 = vmul.f32 %v772_v28, %v762_v7  ;;  %v474_v30 = vmul.f32 %v772_v28, %v756_v60  ;;  %v477_v31 = vmul.f32 %v772_v28, %v760_v5  ;;  %v475_v32 = vmul.f32 %v772_v28, %v758_v61 }
 0x233   :  { %v479_v33 = vmul.f32 %v772_v28, %v766_v16  ;;  %v478_v34 = vmul.f32 %v772_v28, %v764_v9  ;;  %v481_v35 = vmul.f32 %v772_v28, %v770_v22  ;;  %v480_v36 = vmul.f32 %v772_v28, %v768_v19 }
 0x234   :  { %v488_v37 = vsel %vm418_vm2, %v476_v29, 0.0  ;;  %v482_v38 = vsel %vm418_vm2, %v474_v30, 0.0  ;;  %v491_v39 = vsel %vm418_vm2, %v477_v31, 0.0  ;;  %v485_v40 = vsel %vm418_vm2, %v475_v32, 0.0 }
 0x235   :  { %489 = vadd.xlane.f32.xlu1 %v488_v37  ;;  %483 = vadd.xlane.f32.xlu0 %v482_v38  ;;  %v497_v41 = vsel %vm418_vm2, %v479_v33, 0.0  ;;  %v494_v42 = vsel %vm418_vm2, %v478_v34, 0.0  ;;  %v503_v43 = vsel %vm418_vm2, %v481_v35, 0.0  ;;  %v500_v44 = vsel %vm418_vm2, %v480_v36, 0.0 }
 0x239   :  { %492 = vadd.xlane.f32.xlu1 %v491_v39  ;;  %486 = vadd.xlane.f32.xlu0 %v485_v40 }
 0x23d   :  { %498 = vadd.xlane.f32.xlu1 %v497_v41  ;;  %495 = vadd.xlane.f32.xlu0 %v494_v42 }
 0x241   :  { %504 = vadd.xlane.f32.xlu1 %v503_v43  ;;  %501 = vadd.xlane.f32.xlu0 %v500_v44 }
 0x2c2   :  { %v490_v45 = vpop.xlane.xlu1 %489  ;;  %v484_v46 = vpop.xlane.xlu0 %483 }
 0x2c3   :  { %v506_v47 = vmul.f32 0.041666668, %v484_v46  ;;  %v508_v48 = vmul.f32 0.041666668, %v490_v45 }
 0x2c5   :  { %v514_v49 = vmul.f32 %v506_v47, %v877_v2  ;;  %v516_v54 = vmul.f32 %v508_v48, %v887_v4 }
 0x2c6   :  { %v493_v50 = vpop.xlane.xlu1 %492  ;;  %v487_v51 = vpop.xlane.xlu0 %486 }
 0x2c7   :  { %v509_v52 = vmul.f32 0.041666668, %v493_v50  ;;  %v507_v53 = vmul.f32 0.041666668, %v487_v51  ;;  %v522_v56 = vsel %vm91_vm0, %v514_v49, 0.0  ;;  %v525_v2 = vsel %vm91_vm0, %v516_v54, 0.0 }
 0x2c9   :  { %v515_v55 = vmul.f32 %v507_v53, %v882_v3  ;;  %v517_v59 = vmul.f32 %v509_v52, %v894_v6 }
 0x2ca   :  { %v499_v57 = vpop.xlane.xlu1 %498  ;;  %v496_v58 = vpop.xlane.xlu0 %495 }
 0x2cb   :  { %v523_v60 = vsel %vm91_vm0, %v515_v55, 0.0  ;;  %v511_v61 = vmul.f32 0.041666668, %v499_v57  ;;  %v510_v62 = vmul.f32 0.041666668, %v496_v58  ;;  %v527_v3 = vsel %vm91_vm0, %v517_v59, 0.0 }
 0x2cc   :  { %v524_v63 = vadd.f32 %v523_v60, %v522_v56 }
 0x2cd   :  { %v518_v0 = vmul.f32 %v510_v62, %v905_v10  ;;  %v519_v7 = vmul.f32 %v511_v61, %v910_v11 }
 0x2ce   :  { %v526_v1 = vadd.f32 %v525_v2, %v524_v63  ;;  %v505_v5 = vpop.xlane.xlu1 %504  ;;  %v502_v4 = vpop.xlane.xlu0 %501 }
 0x2cf   :  { %v513_v8 = vmul.f32 0.041666668, %v505_v5  ;;  %v512_v9 = vmul.f32 0.041666668, %v502_v4  ;;  %v529_v6 = vsel %vm91_vm0, %v518_v0, 0.0  ;;  %v531_v17 = vsel %vm91_vm0, %v519_v7, 0.0 }
 0x2d0   :  { %v528_v12 = vadd.f32 %v527_v3, %v526_v1 }
 0x2d1   :  { %v520_v13 = vmul.f32 %v512_v9, %v921_v14  ;;  %v521_v18 = vmul.f32 %v513_v8, %v927_v15 }
 0x2d2   :  { %v530_v16 = vadd.f32 %v529_v6, %v528_v12 }
 0x2d3   :  { %v533_v19 = vsel %vm91_vm0, %v520_v13, 0.0  ;;  %v535_v11 = vsel %vm91_vm0, %v521_v18, 0.0 }
 0x2d4   :  { %v532_v10 = vadd.f32 %v531_v17, %v530_v16 }
 0x2d6   :  { %v534_v20 = vadd.f32 %v533_v19, %v532_v10 }
 0x2d8   :  { %v536_v21 = vadd.f32 %v535_v11, %v534_v20 }
 0x2da   :  { %537 = vst.msk [vmem:[#allocation5] sm:$0xff] %vm91_vm0, %v536_v21 }
 0x2db   :  { %806 = shalt.err (!%p803_p12)
}
 0x2dc   :  { %s807_s25 = scalar_lea.hbm %s1063_s6, 128 }
 0x2dd   :  { %p808_p13 = scmp.ne.s32.totalorder %s1063_s6, %s807_s25  ;;  %p811_p0 = scmp.lt.u32.totalorder %s807_s25, %s1063_s6 }
 0x2df   :  { %p813_p1 = pnand %p811_p0, %p808_p13 }
 0x2e1   :  { %816 = shalt.err (!%p813_p1)
}
 0x2e2   :  { %547 = dma.vmem_to_hbm [thread:$0]  %s545_s5, 128, %s1063_s6, [#allocation4]  }
 0x2e3   :  { %819 = dma.done.wait [#allocation4], 128  }
 0x2e4   :  { %820 = vsyncadd [#allocation4], 4294967168 }
 0x2e5   :  { %551 = vsyncpa [#allocation3], 1 }
 0x2e6   :  { %552 = vsyncpa [#allocation4], 1 }

</bundles_post_ra>
